<compile_context>
chip_gen: v7x
topology: tpu7x:2x2x1
jax: 0.10.0
libtpu: 0.0.40
codegen_flags: <defaults>
</compile_context>

<pallas_src>
import functools

import jax
import jax.numpy as jnp
from jax.experimental import pallas as pl
from jax.experimental.pallas import tpu as pltpu

LANE = 128                      # lanes per vreg
SUB = 8                         # sublanes per vreg
ROW_CHUNK = SUB * LANE          # 1024 rows: keeps out-block sublane dim % 8 == 0
D_TILE_MAX = 2048               # feature-axis tile cap (VMEM guard for huge D)
VMEM_TARGET = 32 * 2 ** 20      # resident footprint target (before headroom)
VMEM_CAP = 48 * 2 ** 20         # explicit limit stays v7x-safe (64 MiB per TC)


def _round_up(x, m):
    return ((x + m - 1) // m) * m


def _linreg_kernel(x_ref, w_ref, b_ref, o_ref, *, d_total, tile_d, ragged_d):
    """One (row-tile, feature-tile) grid step of y = X @ w + b.

    x_ref: (g, 128, tile_d) VMEM tile of rows of X (group r, lane-slot s == row 128*r+s)
    w_ref: (1, tile_d)      VMEM-resident slice of the weight row
    b_ref: (1,)             SMEM scalar bias
    o_ref: (g, 128)         lane-dense output slab (accumulated across feature tiles)
    """
    kd = pl.program_id(1)

    @pl.when(kd == 0)
    def _init():
        o_ref[...] = jnp.zeros_like(o_ref)

    x = x_ref[...]              # (g, 128, tile_d)
    w = w_ref[...]              # (1, tile_d) -> broadcasts over (g, 128, tile_d)

    if ragged_d:
        # Last feature tile can hang past D: zero the out-of-bounds lanes of the
        # product (both x and w are garbage there).
        lane_pos = jax.lax.broadcasted_iota(jnp.int32, x.shape[:2] + (LANE,), 2)
        valid = d_total - kd * tile_d

    # Accumulate 128-lane chunks with plain VPU adds; a single cross-lane reduce
    # per row runs at the end (item 4b: keeps XLU work ~constant per row).
    y = jnp.zeros(x.shape[:2], jnp.float32)
    part = None
    for c in range(0, tile_d, LANE):
        cw = min(LANE, tile_d - c)
        prod = x[:, :, c:c + cw] * w[:, c:c + cw]
        if ragged_d:                       # only possible when cw == LANE
            prod = jnp.where(lane_pos < valid - c, prod, 0.0)
        if cw == LANE:
            part = prod if part is None else part + prod
        else:
            y = y + jnp.sum(prod, axis=-1)
    if part is not None:
        y = y + jnp.sum(part, axis=-1)

    o_ref[...] += y

    @pl.when(kd == pl.num_programs(1) - 1)
    def _finalize():
        o_ref[...] = o_ref[...] + b_ref[0]


def lin_reg_forward(x, weight, bias):
    """x: (N, D) f32, weight: (1, D) f32 (PyTorch layout), bias: (1,) f32 -> (N, 1) f32."""
    n, d = x.shape
    x = x.astype(jnp.float32)
    w = weight.reshape(1, d).astype(jnp.float32)
    b = bias.reshape(1).astype(jnp.float32)

    # --- feature-axis tiling (only needed for very large D) -----------------------
    tile_d = d if d <= D_TILE_MAX else D_TILE_MAX
    num_d_tiles = pl.cdiv(d, tile_d)
    ragged_d = (d % tile_d) != 0           # only possible when num_d_tiles > 1

    # --- row-axis tiling -----------------------------------------------------------
    # Budget ~2x (lane-padded X block) + 2x (f32 out block) against VMEM_TARGET, so
    # each double-buffered X block is ~16 MiB for D >= 128 and the HBM payload per
    # grid step stays >= ~4 MiB even for small, lane-padded D.
    d_pad = _round_up(tile_d, LANE)
    bytes_per_row = 2 * d_pad * 4 + 2 * 4
    budget_rows = max(ROW_CHUNK,
                      (VMEM_TARGET // bytes_per_row) // ROW_CHUNK * ROW_CHUNK)
    # Keep >= 2 row tiles for non-tiny N so the "parallel" axis can use both
    # TensorCores on v7x.
    split_rows = ROW_CHUNK * pl.cdiv(pl.cdiv(n, 2), ROW_CHUNK)
    tile_rows = max(ROW_CHUNK, min(budget_rows, split_rows))
    g = tile_rows // LANE                  # out-block sublane rows (multiple of 8)

    n128 = pl.cdiv(n, LANE)                # lane-packed row groups of X
    if g > n128:                           # tiny input: a single exact block
        g = n128

    # --- layout plumbing (wrapper side) ---------------------------------------------
    # (N, D) -> (N/128, 128, D) is a free row-major reshape when N % 128 == 0.
    # Otherwise pad only to the next 128-row boundary (<= 127 rows); ragged *tile*
    # tails are handled by the grid itself, so no padding to tile multiples.
    if n % LANE != 0:
        x = jnp.pad(x, ((0, n128 * LANE - n), (0, 0)))
    x3 = x.reshape(n128, LANE, d)

    num_row_tiles = pl.cdiv(n128, g)
    out_rows = num_row_tiles * g           # round up so output blocks never go OOB

    # Explicit VMEM limit: computed footprint + ~30% headroom, capped v7x-safe.
    resident_bytes = g * LANE * bytes_per_row + 2 * SUB * d_pad * 4
    vmem_limit = int(min(VMEM_CAP, max(16 * 2 ** 20, resident_bytes * 1.3)))

    kernel = functools.partial(_linreg_kernel, d_total=d, tile_d=tile_d,
                               ragged_d=ragged_d)

    out2d = pl.pallas_call(
        kernel,
        out_shape=jax.ShapeDtypeStruct((out_rows, LANE), jnp.float32),
        grid=(num_row_tiles, num_d_tiles),
        in_specs=[
            pl.BlockSpec((g, LANE, tile_d), lambda i, kd: (i, 0, kd)),   # X tile
            pl.BlockSpec((1, tile_d), lambda i, kd: (0, kd)),            # W slice
            pl.BlockSpec(memory_space=pltpu.MemorySpace.SMEM),           # bias scalar
        ],
        out_specs=pl.BlockSpec((g, LANE), lambda i, kd: (i, 0)),         # lane-dense out
        compiler_params=pltpu.CompilerParams(
            dimension_semantics=("parallel", "arbitrary"),
            vmem_limit_bytes=vmem_limit,
        ),
        cost_estimate=pl.CostEstimate(
            flops=2 * n * d,
            transcendentals=0,
            bytes_accessed=(n * d + d + n) * 4,
        ),
    )(x3, w, b)

    # Undo the lane-dense packing: row-major flatten, drop padding, back to (N, 1).
    return out2d.reshape(-1)[:n].reshape(n, 1)


if __name__ == "__main__":
    key = jax.random.PRNGKey(0)
    kx, kw, kb = jax.random.split(key, 3)

    N, INPUT_DIM = 8, 32

    # Example input X (the module just applies a linear layer to it).
    x = jax.random.normal(kx, (N, INPUT_DIM), dtype=jnp.float32)

    # Deterministic parameter init mimicking nn.Linear default:
    # uniform(-1/sqrt(in_features), +1/sqrt(in_features)).
    bound = 1.0 / jnp.sqrt(jnp.float32(INPUT_DIM))
    weight = jax.random.uniform(kw, (1, INPUT_DIM), jnp.float32, -bound, bound)
    bias = jax.random.uniform(kb, (1,), jnp.float32, -bound, bound)

    out = jax.block_until_ready(lin_reg_forward(x, weight, bias))

    # Cross-check against plain JAX reference of the same forward pass.
    ref = x @ weight.T + bias
    assert out.shape == (N, 1)
    assert jnp.allclose(out, ref, atol=1e-5, rtol=1e-5)

    print("KERNEL_OK")
</pallas_src>

<mosaic_0001>
module attributes {stable_mosaic.version = 11 : i64} {
  func.func @_linreg_kernel(%arg0: i32, %arg1: i32, %arg2: memref<1x128x32xf32, #tpu.memory_space<vmem>>, %arg3: memref<1x32xf32, #tpu.memory_space<vmem>>, %arg4: memref<1xf32, #tpu.memory_space<smem>>, %arg5: memref<1x128xf32, #tpu.memory_space<vmem>>) attributes {dimension_semantics = [#tpu.dimension_semantics<parallel>, #tpu.dimension_semantics<arbitrary>], iteration_bounds = array<i64: 1, 1>, scalar_prefetch = 0 : i64, scratch_operands = 0 : i64, tpu.core_type = #tpu.core_type<tc>, window_params = [{transform_indices = @transform_0, window_bounds = array<i64: 1, 128, 32>}, {transform_indices = @transform_1, window_bounds = array<i64: 1, 32>}, {transform_indices = @transform_2, window_bounds = array<i64: 1>}, {transform_indices = @transform_3, window_bounds = array<i64: 1, 128>}]} {
    %c0_i32 = arith.constant 0 : i32
    %0 = arith.cmpi eq, %arg1, %c0_i32 : i32
    %1 = arith.extui %0 : i1 to i32
    %c0_i32_0 = arith.constant 0 : i32
    %2 = arith.cmpi ne, %1, %c0_i32_0 : i32
    scf.if %2 {
      %cst_12 = arith.constant 0.000000e+00 : f32
      %17 = vector.broadcast %cst_12 : f32 to vector<1x128xf32>
      %c0_13 = arith.constant 0 : index
      %c0_14 = arith.constant 0 : index
      %18 = vector.load %arg5[%c0_13, %c0_14] : memref<1x128xf32, #tpu.memory_space<vmem>>, vector<1x128xf32>
      tpu.vector_store %arg5[%c0_13, %c0_14], %17 {strides = array<i32>} : memref<1x128xf32, #tpu.memory_space<vmem>>, vector<1x128xf32>,
    } else {
    }
    %c0 = arith.constant 0 : index
    %c0_1 = arith.constant 0 : index
    %c0_2 = arith.constant 0 : index
    %3 = vector.load %arg2[%c0, %c0_1, %c0_2] : memref<1x128x32xf32, #tpu.memory_space<vmem>>, vector<1x128x32xf32>
    %c0_3 = arith.constant 0 : index
    %c0_4 = arith.constant 0 : index
    %4 = vector.load %arg3[%c0_3, %c0_4] : memref<1x32xf32, #tpu.memory_space<vmem>>, vector<1x32xf32>
    %cst = arith.constant 0.000000e+00 : f32
    %5 = vector.broadcast %cst : f32 to vector<1x128xf32>
    %6 = vector.shape_cast %4 : vector<1x32xf32> to vector<1x1x32xf32>
    %7 = vector.broadcast %6 : vector<1x1x32xf32> to vector<1x128x32xf32>
    %8 = arith.mulf %3, %7 : vector<1x128x32xf32>
    %cst_5 = arith.constant dense<0.000000e+00> : vector<1x128xf32>
    %9 = vector.multi_reduction <add>, %8, %cst_5 [2] : vector<1x128x32xf32> to vector<1x128xf32>
    %10 = arith.addf %5, %9 : vector<1x128xf32>
    %c0_6 = arith.constant 0 : index
    %c0_7 = arith.constant 0 : index
    %11 = vector.load %arg5[%c0_6, %c0_7] : memref<1x128xf32, #tpu.memory_space<vmem>>, vector<1x128xf32>
    %12 = arith.addf %11, %10 : vector<1x128xf32>
    %c0_8 = arith.constant 0 : index
    %c0_9 = arith.constant 0 : index
    %13 = vector.load %arg5[%c0_8, %c0_9] : memref<1x128xf32, #tpu.memory_space<vmem>>, vector<1x128xf32>
    tpu.vector_store %arg5[%c0_8, %c0_9], %12 {strides = array<i32>} : memref<1x128xf32, #tpu.memory_space<vmem>>, vector<1x128xf32>,
    %c0_i32_10 = arith.constant 0 : i32
    %14 = arith.cmpi eq, %arg1, %c0_i32_10 : i32
    %15 = arith.extui %14 : i1 to i32
    %c0_i32_11 = arith.constant 0 : i32
    %16 = arith.cmpi ne, %15, %c0_i32_11 : i32
    scf.if %16 {
      %c0_12 = arith.constant 0 : index
      %c0_13 = arith.constant 0 : index
      %17 = vector.load %arg5[%c0_12, %c0_13] : memref<1x128xf32, #tpu.memory_space<vmem>>, vector<1x128xf32>
      %c0_14 = arith.constant 0 : index
      %18 = memref.load %arg4[%c0_14] : memref<1xf32, #tpu.memory_space<smem>>
      %19 = vector.broadcast %18 : f32 to vector<1x128xf32>
      %20 = arith.addf %17, %19 : vector<1x128xf32>
      %c0_15 = arith.constant 0 : index
      %c0_16 = arith.constant 0 : index
      %21 = vector.load %arg5[%c0_15, %c0_16] : memref<1x128xf32, #tpu.memory_space<vmem>>, vector<1x128xf32>
      tpu.vector_store %arg5[%c0_15, %c0_16], %20 {strides = array<i32>} : memref<1x128xf32, #tpu.memory_space<vmem>>, vector<1x128xf32>,
    } else {
    }
    return
  }
  func.func @transform_0(%arg0: i32, %arg1: i32) -> (i32, i32, i32) {
    %c0_i32 = arith.constant 0 : i32
    %c0_i32_0 = arith.constant 0 : i32
    return %arg0, %c0_i32, %arg1 : i32, i32, i32
  }
  func.func @transform_1(%arg0: i32, %arg1: i32) -> (i32, i32) {
    %c0_i32 = arith.constant 0 : i32
    %c0_i32_0 = arith.constant 0 : i32
    return %c0_i32, %arg1 : i32, i32
  }
  func.func @transform_2(%arg0: i32, %arg1: i32) -> i32 {
    %c0_i32 = arith.constant 0 : i32
    %c0_i32_0 = arith.constant 0 : i32
    return %c0_i32 : i32
  }
  func.func @transform_3(%arg0: i32, %arg1: i32) -> (i32, i32) {
    %c0_i32 = arith.constant 0 : i32
    %c0_i32_0 = arith.constant 0 : i32
    return %arg0, %c0_i32 : i32, i32
  }
}

</mosaic_0001>

<bundles_post_ra>
// kernel: tpu_custom_call.1
= control target key start
LH: loop header
LB: loop body
LE: loop exit
PB: predicated region body
PF: predicated region fallthrough
CT: control target
= control target key end

     0   :  { %vm60_vm0 = vcmask 261120   ;;  %s2094_s0 = inlined_call_operand.vmem [shape: f32[1,128,32], index: 0, kind: input, shape index: {}]   ;;  %s2095_s1 = inlined_call_operand.vmem [shape: f32[1,32], index: 1, kind: input, shape index: {}]   ;;  %s2096_s2 = inlined_call_operand.<no memory space> [shape: f32[1], index: 2, kind: input, shape index: {}]   ;;  %s2097_s3 = inlined_call_operand.hbm [shape: f32[1,128], index: 3, kind: output, shape index: {}]  }
   0x1   :  { %v21_v0 = vld [vmem:[%s2094_s0] sm:$0xff]  ;;  %v23_v2 = vld [vmem:[%s2094_s0 + $0x10] sm:$0xff]  ;;  %v22_v5 = vld [vmem:[%s2094_s0 + $0x8] sm:$0xff] }
   0x2   :  { %v1636_v1 = vld [vmem:[%s2095_s1] ss:$0 sm:$0xff]  ;;  %v24_v6 = vld [vmem:[%s2094_s0 + $0x18] sm:$0xff]  ;;  %v26_v9 = vld [vmem:[%s2094_s0 + $0x28] sm:$0xff] }
   0x3   :  { %v44_v3 = vmul.f32 %v1636_v1, %v21_v0  ;;  %v46_v4 = vmul.f32 %v1636_v1, %v23_v2  ;;  %v45_v7 = vmul.f32 %v1636_v1, %v22_v5  ;;  %v47_v8 = vmul.f32 %v1636_v1, %v24_v6  ;;  %v25_v10 = vld [vmem:[%s2094_s0 + $0x20] sm:$0xff] }
   0x4   :  { %v49_v15 = vmul.f32 %v1636_v1, %v26_v9  ;;  %v48_v16 = vmul.f32 %v1636_v1, %v25_v10 }
   0x5   :  { %v61_v11 = vsel %vm60_vm0, %v44_v3, 0.0  ;;  %v67_v12 = vsel %vm60_vm0, %v46_v4, 0.0  ;;  %v64_v13 = vsel %vm60_vm0, %v45_v7, 0.0  ;;  %v70_v14 = vsel %vm60_vm0, %v47_v8, 0.0 }
   0x6   :  { %62 = vadd.xlane.f32.xlu0 %v61_v11  ;;  %68 = vadd.xlane.f32.xlu1 %v67_v12 }
   0x7   :  { %9 = vsyncpa [#allocation4], 0  ;;  %v28_v17 = vld [vmem:[%s2094_s0 + $0x38] sm:$0xff]  ;;  %v27_v18 = vld [vmem:[%s2094_s0 + $0x30] sm:$0xff]  ;;  %v76_v19 = vsel %vm60_vm0, %v49_v15, 0.0  ;;  %v73_v21 = vsel %vm60_vm0, %v48_v16, 0.0  ;;  %v142_v50 = vlaneseq }
   0x8   :  { %v51_v20 = vmul.f32 %v1636_v1, %v28_v17  ;;  %v50_v22 = vmul.f32 %v1636_v1, %v27_v18  ;;  %v30_v23 = vld [vmem:[%s2094_s0 + $0x48] sm:$0xff]  ;;  %v29_v24 = vld [vmem:[%s2094_s0 + $0x40] sm:$0xff]  ;;  %v32_v29 = vld [vmem:[%s2094_s0 + $0x58] sm:$0xff]  ;;  %v1667_v47 = vmov 0   ;;  %v1668_v51 = vmov 1966171168  }
   0x9   :  { %v53_v26 = vmul.f32 %v1636_v1, %v30_v23  ;;  %v52_v28 = vmul.f32 %v1636_v1, %v29_v24  ;;  %v31_v30 = vld [vmem:[%s2094_s0 + $0x50] sm:$0xff]  ;;  %v55_v32 = vmul.f32 %v1636_v1, %v32_v29  ;;  %v34_v35 = vld [vmem:[%s2094_s0 + $0x68] sm:$0xff]  ;;  %v33_v36 = vld [vmem:[%s2094_s0 + $0x60] sm:$0xff]  ;;  %1641 = vset.pattern.permute.xlu0 %v1667_v47  ;;  %1642 = vset.pattern.permute.xlu1 %v1667_v47  ;;  %v659_v52 = vunpack.c.l.s4 %v1668_v51  ;;  %s1670_s19 = smov [#allocation3]  }
   0xa   :  { %65 = vadd.xlane.f32.xlu0 %v64_v13  ;;  %71 = vadd.xlane.f32.xlu1 %v70_v14  ;;  %v82_v25 = vsel %vm60_vm0, %v51_v20, 0.0  ;;  %v79_v27 = vsel %vm60_vm0, %v50_v22, 0.0  ;;  %v54_v34 = vmul.f32 %v1636_v1, %v31_v30  ;;  %v57_v38 = vmul.f32 %v1636_v1, %v34_v35  ;;  %v36_v39 = vld [vmem:[%s2094_s0 + $0x78] sm:$0xff]  ;;  %v35_v42 = vld [vmem:[%s2094_s0 + $0x70] sm:$0xff]  ;;  %s1628_s20 = sshll.u32 %s1670_s19, 4  ;;  %s1629_s20 = int_to_ptr.vmem [resolvable:$true] %s1628_s20 }
   0xb   :  { %v88_v31 = vsel %vm60_vm0, %v53_v26, 0.0  ;;  %v85_v33 = vsel %vm60_vm0, %v52_v28, 0.0  ;;  %v94_v37 = vsel %vm60_vm0, %v55_v32, 0.0  ;;  %v56_v41 = vmul.f32 %v1636_v1, %v33_v36  ;;  %s1643_s21 = scalar_lea.vmem %s1629_s20, 16  ;;  %s1647_s22 = scalar_lea.vmem %s1629_s20, 32 }
   0xc   :  { %v91_v40 = vsel %vm60_vm0, %v54_v34, 0.0  ;;  %v59_v43 = vmul.f32 %v1636_v1, %v36_v39  ;;  %v100_v44 = vsel %vm60_vm0, %v57_v38, 0.0  ;;  %v58_v46 = vmul.f32 %v1636_v1, %v35_v42  ;;  %p1644_p0 = scmp.ne.s32.totalorder %s1629_s20, %s1643_s21  ;;  %p1648_p1 = scmp.lt.s32.totalorder %s1629_s20, %s1629_s20 }
   0xd   :  { %v97_v45 = vsel %vm60_vm0, %v56_v41, 0.0  ;;  %v1759_v53 = vshrl.u32 %v142_v50, 7  ;;  %v660_v54 = vunpack.c.0.s8 %v659_v52  ;;  %vm1497_vm1 = vcmask 130112   ;;  %p1649_p2 = scmp.lt.s32.totalorder %s1647_s22, %s1643_s21 }
   0xe   :  { %77 = vadd.xlane.f32.xlu1 %v76_v19  ;;  %74 = vadd.xlane.f32.xlu0 %v73_v21  ;;  %v106_v48 = vsel %vm60_vm0, %v59_v43, 0.0  ;;  %v103_v49 = vsel %vm60_vm0, %v58_v46, 0.0  ;;  %vm1504_vm2 = vcmask 195712   ;;  %vm1511_vm3 = vcmask 261312  }
   0xf   :  { %v1762_v55 = vsub.s32 0, %v1759_v53  ;;  %v1765_v56 = vsub.s32 1, %v1759_v53  ;;  %v1768_v57 = vsub.s32 2, %v1759_v53  ;;  %v1771_v58 = vsub.s32 3, %v1759_v53  ;;  %p1650_p3 = por %p1649_p2, %p1648_p1 }
  0x10   :  { %v1774_v59 = vsub.s32 4, %v1759_v53  ;;  %v1777_v60 = vsub.s32 5, %v1759_v53  ;;  %v1780_v61 = vsub.s32 6, %v1759_v53  ;;  %v1783_v62 = vsub.s32 7, %v1759_v53 }
  0x11   :  { %v1786_v1 = vsub.s32 %v660_v54, %v1759_v53  ;;  %vm1518_vm4 = vcmask 326912   ;;  %vm1525_vm5 = vcmask 392512   ;;  %vm1532_vm6 = vcmask 458112   ;;  %p1651_p4 = pnand %p1650_p3, %p1644_p0 }
  0x12   :  { %83 = vadd.xlane.f32.xlu1 %v82_v25  ;;  %80 = vadd.xlane.f32.xlu0 %v79_v27  ;;  %vm1539_vm7 = vcmask 523712   ;;  %vm1546_vm8 = vcmask 589312   ;;  %vm1553_vm9 = vcmask 654912   ;;  %vm1560_vm10 = vcmask 720512  }
  0x13   :  { %vm1567_vm11 = vcmask 786112   ;;  %vm1574_vm12 = vcmask 851712   ;;  %vm1581_vm13 = vcmask 917312   ;;  %vm1588_vm14 = vcmask 982912  }
  0x14   :  { %vm1595_vm15 = vcmask 1048512  }
  0x16   :  { %89 = vadd.xlane.f32.xlu1 %v88_v31  ;;  %86 = vadd.xlane.f32.xlu0 %v85_v33 }
  0x1a   :  { %95 = vadd.xlane.f32.xlu1 %v94_v37  ;;  %92 = vadd.xlane.f32.xlu0 %v91_v40 }
  0x1e   :  { %101 = vadd.xlane.f32.xlu1 %v100_v44  ;;  %98 = vadd.xlane.f32.xlu0 %v97_v45 }
  0x22   :  { %107 = vadd.xlane.f32.xlu1 %v106_v48  ;;  %104 = vadd.xlane.f32.xlu0 %v103_v49 }
  0x93   :  { %v63_v63 = vpop.xlane.xlu0 %62  ;;  %v69_v0 = vpop.xlane.xlu1 %68 }
  0x94   :  { %v145_v2 = vrot.slane %v63_v63, %v1762_v55  ;;  %v149_v3 = vrot.slane %v63_v63, %v1765_v56  ;;  %v153_v4 = vrot.slane %v63_v63, %v1768_v57  ;;  %v157_v5 = vrot.slane %v63_v63, %v1771_v58 }
  0x95   :  { %v161_v6 = vrot.slane %v63_v63, %v1774_v59  ;;  %v165_v7 = vrot.slane %v63_v63, %v1777_v60  ;;  %v169_v8 = vrot.slane %v63_v63, %v1780_v61  ;;  %v173_v9 = vrot.slane %v63_v63, %v1783_v62 }
  0x96   :  { %v654_v10 = vcombine.low %v145_v2, %v149_v3  ;;  %v655_v11 = vcombine.low %v153_v4, %v157_v5  ;;  %v209_v12 = vrot.slane %v69_v0, %v1762_v55  ;;  %v213_v13 = vrot.slane %v69_v0, %v1765_v56 }
  0x97   :  { %v66_v14 = vpop.xlane.xlu0 %65  ;;  %v1798_v15 = vpop.xlane.xlu1 %71  ;;  %v656_v16 = vcombine.low %v161_v6, %v165_v7  ;;  %v657_v17 = vcombine.low %v169_v8, %v173_v9  ;;  %v217_v18 = vrot.slane %v69_v0, %v1768_v57  ;;  %v221_v19 = vrot.slane %v69_v0, %v1771_v58 }
  0x98   :  { %v664_v20 = vrot.slane %v654_v10, %v1786_v1  ;;  %v671_v21 = vrot.slane %v655_v11, %v1786_v1  ;;  %v177_v22 = vrot.slane %v66_v14, %v1762_v55  ;;  %v181_v23 = vrot.slane %v66_v14, %v1765_v56 }
  0x99   :  { %v678_v24 = vrot.slane %v656_v16, %v1786_v1  ;;  %v685_v25 = vrot.slane %v657_v17, %v1786_v1  ;;  %v185_v26 = vrot.slane %v66_v14, %v1768_v57  ;;  %v189_v27 = vrot.slane %v66_v14, %v1771_v58 }
  0x9a   :  { %v686_v28 = vcombine.low %v664_v20, %v671_v21  ;;  %v193_v29 = vrot.slane %v66_v14, %v1774_v59  ;;  %v197_v30 = vrot.slane %v66_v14, %v1777_v60  ;;  %v201_v31 = vrot.slane %v66_v14, %v1780_v61 }
  0x9b   :  { %v1813_v32 = vpop.xlane.xlu1 %77  ;;  %v687_v33 = vcombine.low %v678_v24, %v685_v25  ;;  %v205_v34 = vrot.slane %v66_v14, %v1783_v62  ;;  %v703_v35 = vcombine.low %v177_v22, %v181_v23  ;;  %v704_v36 = vcombine.low %v185_v26, %v189_v27 }
  0x9c   :  { %v694_v37 = vrot.slane %v686_v28, %v1786_v1  ;;  %v705_v38 = vcombine.low %v193_v29, %v197_v30  ;;  %v225_v39 = vrot.slane %v69_v0, %v1774_v59  ;;  %v229_v40 = vrot.slane %v69_v0, %v1777_v60 }
  0x9d   :  { %v701_v41 = vrot.slane %v687_v33, %v1786_v1  ;;  %v706_v42 = vcombine.low %v201_v31, %v205_v34  ;;  %v713_v43 = vrot.slane %v703_v35, %v1786_v1  ;;  %v720_v44 = vrot.slane %v704_v36, %v1786_v1 }
  0x9e   :  { %v727_v45 = vrot.slane %v705_v38, %v1786_v1  ;;  %v233_v46 = vrot.slane %v69_v0, %v1780_v61  ;;  %v237_v47 = vrot.slane %v69_v0, %v1783_v62  ;;  %v752_v48 = vcombine.low %v209_v12, %v213_v13  ;;  %v75_v13 = vpop.xlane.xlu0 %74 }
  0x9f   :  { %v702_v49 = vcombine.low %v694_v37, %v701_v41  ;;  %v734_v51 = vrot.slane %v706_v42, %v1786_v1  ;;  %v735_v52 = vcombine.low %v713_v43, %v720_v44  ;;  %v753_v54 = vcombine.low %v217_v18, %v221_v19  ;;  %v1829_v5 = vpop.xlane.xlu1 %83 }
  0xa0   :  { %v754_v63 = vcombine.low %v225_v39, %v229_v40  ;;  %v755_v2 = vcombine.low %v233_v46, %v237_v47  ;;  %v762_v3 = vrot.slane %v752_v48, %v1786_v1  ;;  %v241_v4 = vrot.slane %v1798_v15, %v1762_v55 }
  0xa1   :  { %1439 = vperm.xlu0 %1641, %v702_v49   ;;  %v736_v6 = vcombine.low %v727_v45, %v734_v51  ;;  %v743_v7 = vrot.slane %v735_v52, %v1786_v1  ;;  %v769_v0 = vrot.slane %v753_v54, %v1786_v1  ;;  %v245_v8 = vrot.slane %v1798_v15, %v1765_v56 }
  0xa2   :  { %v776_v9 = vrot.slane %v754_v63, %v1786_v1  ;;  %v783_v10 = vrot.slane %v755_v2, %v1786_v1  ;;  %v249_v11 = vrot.slane %v1798_v15, %v1768_v57  ;;  %v253_v12 = vrot.slane %v1798_v15, %v1771_v58 }
  0xa3   :  { %v750_v14 = vrot.slane %v736_v6, %v1786_v1  ;;  %v784_v16 = vcombine.low %v762_v3, %v769_v0  ;;  %v257_v17 = vrot.slane %v1798_v15, %v1774_v59  ;;  %v261_v18 = vrot.slane %v1798_v15, %v1777_v60  ;;  %v90_v31 = vpop.xlane.xlu1 %89 }
  0xa4   :  { %v785_v19 = vcombine.low %v776_v9, %v783_v10  ;;  %v265_v20 = vrot.slane %v1798_v15, %v1780_v61  ;;  %v269_v21 = vrot.slane %v1798_v15, %v1783_v62  ;;  %v801_v22 = vcombine.low %v241_v4, %v245_v8 }
  0xa5   :  { %v751_v23 = vcombine.low %v743_v7, %v750_v14  ;;  %v792_v24 = vrot.slane %v784_v16, %v1786_v1  ;;  %v802_v25 = vcombine.low %v249_v11, %v253_v12  ;;  %v803_v26 = vcombine.low %v257_v17, %v261_v18 }
  0xa6   :  { %v799_v27 = vrot.slane %v785_v19, %v1786_v1  ;;  %v804_v28 = vcombine.low %v265_v20, %v269_v21  ;;  %v811_v29 = vrot.slane %v801_v22, %v1786_v1  ;;  %v273_v30 = vrot.slane %v75_v13, %v1762_v55 }
  0xa7   :  { %1442 = vperm.xlu1 %1642, %v751_v23   ;;  %v818_v33 = vrot.slane %v802_v25, %v1786_v1  ;;  %v825_v34 = vrot.slane %v803_v26, %v1786_v1  ;;  %v277_v15 = vrot.slane %v75_v13, %v1765_v56  ;;  %v281_v35 = vrot.slane %v75_v13, %v1768_v57  ;;  %v96_v25 = vpop.xlane.xlu1 %95 }
  0xa8   :  { %v800_v36 = vcombine.low %v792_v24, %v799_v27  ;;  %v832_v37 = vrot.slane %v804_v28, %v1786_v1  ;;  %v285_v38 = vrot.slane %v75_v13, %v1771_v58  ;;  %v289_v39 = vrot.slane %v75_v13, %v1774_v59 }
  0xa9   :  { %v833_v40 = vcombine.low %v811_v29, %v818_v33  ;;  %v293_v41 = vrot.slane %v75_v13, %v1777_v60  ;;  %v297_v42 = vrot.slane %v75_v13, %v1780_v61  ;;  %v301_v43 = vrot.slane %v75_v13, %v1783_v62 }
  0xaa   :  { %v834_v44 = vcombine.low %v825_v34, %v832_v37  ;;  %v850_v45 = vcombine.low %v273_v30, %v277_v15  ;;  %v851_v46 = vcombine.low %v281_v35, %v285_v38  ;;  %v433_v47 = vrot.slane %v90_v31, %v1762_v55 }
  0xab   :  { %1445 = vperm.xlu1 %1642, %v800_v36   ;;  %v841_v48 = vrot.slane %v833_v40, %v1786_v1  ;;  %v852_v49 = vcombine.low %v289_v39, %v293_v41  ;;  %v853_v51 = vcombine.low %v297_v42, %v301_v43  ;;  %v437_v52 = vrot.slane %v90_v31, %v1765_v56 }
  0xac   :  { %v848_v54 = vrot.slane %v834_v44, %v1786_v1  ;;  %v860_v63 = vrot.slane %v850_v45, %v1786_v1  ;;  %v867_v2 = vrot.slane %v851_v46, %v1786_v1  ;;  %v441_v3 = vrot.slane %v90_v31, %v1768_v57 }
  0xad   :  { %v874_v4 = vrot.slane %v852_v49, %v1786_v1  ;;  %v881_v6 = vrot.slane %v853_v51, %v1786_v1  ;;  %v445_v7 = vrot.slane %v90_v31, %v1771_v58  ;;  %v449_v0 = vrot.slane %v90_v31, %v1774_v59  ;;  %v81_v49 = vpop.xlane.xlu0 %80 }
  0xae   :  { %v849_v8 = vcombine.low %v841_v48, %v848_v54  ;;  %v882_v9 = vcombine.low %v860_v63, %v867_v2  ;;  %v453_v10 = vrot.slane %v90_v31, %v1777_v60  ;;  %v457_v11 = vrot.slane %v90_v31, %v1780_v61 }
  0xaf   :  { %v883_v12 = vcombine.low %v874_v4, %v881_v6  ;;  %v461_v13 = vrot.slane %v90_v31, %v1783_v62  ;;  %v1095_v14 = vcombine.low %v433_v47, %v437_v52  ;;  %v1096_v16 = vcombine.low %v441_v3, %v445_v7 }
  0xb0   :  { %1448 = vperm.xlu1 %1642, %v849_v8   ;;  %v890_v17 = vrot.slane %v882_v9, %v1786_v1  ;;  %v1097_v18 = vcombine.low %v449_v0, %v453_v10  ;;  %v305_v19 = vrot.slane %v1813_v32, %v1762_v55  ;;  %v309_v20 = vrot.slane %v1813_v32, %v1765_v56 }
  0xb1   :  { %v897_v21 = vrot.slane %v883_v12, %v1786_v1  ;;  %v1098_v22 = vcombine.low %v457_v11, %v461_v13  ;;  %v1105_v23 = vrot.slane %v1095_v14, %v1786_v1  ;;  %v1112_v24 = vrot.slane %v1096_v16, %v1786_v1 }
  0xb2   :  { %v1119_v26 = vrot.slane %v1097_v18, %v1786_v1  ;;  %v313_v27 = vrot.slane %v1813_v32, %v1768_v57  ;;  %v317_v28 = vrot.slane %v1813_v32, %v1771_v58  ;;  %v321_v29 = vrot.slane %v1813_v32, %v1774_v59 }
  0xb3   :  { %v898_v30 = vcombine.low %v890_v17, %v897_v21  ;;  %v1126_v31 = vrot.slane %v1098_v22, %v1786_v1  ;;  %v1127_v33 = vcombine.low %v1105_v23, %v1112_v24  ;;  %v325_v34 = vrot.slane %v1813_v32, %v1777_v60 }
  0xb4   :  { %v329_v15 = vrot.slane %v1813_v32, %v1780_v61  ;;  %v333_v35 = vrot.slane %v1813_v32, %v1783_v62  ;;  %v899_v36 = vcombine.low %v305_v19, %v309_v20  ;;  %v900_v37 = vcombine.low %v313_v27, %v317_v28  ;;  %v102_v19 = vpop.xlane.xlu1 %101 }
  0xb5   :  { %1451 = vperm.xlu1 %1642, %v898_v30   ;;  %v1128_v38 = vcombine.low %v1119_v26, %v1126_v31  ;;  %v1135_v39 = vrot.slane %v1127_v33, %v1786_v1  ;;  %v901_v40 = vcombine.low %v321_v29, %v325_v34  ;;  %v497_v41 = vrot.slane %v96_v25, %v1762_v55 }
  0xb6   :  { %v902_v42 = vcombine.low %v329_v15, %v333_v35  ;;  %v909_v43 = vrot.slane %v899_v36, %v1786_v1  ;;  %v916_v44 = vrot.slane %v900_v37, %v1786_v1  ;;  %v501_v45 = vrot.slane %v96_v25, %v1765_v56 }
  0xb7   :  { %v1142_v46 = vrot.slane %v1128_v38, %v1786_v1  ;;  %v923_v32 = vrot.slane %v901_v40, %v1786_v1  ;;  %v505_v47 = vrot.slane %v96_v25, %v1768_v57  ;;  %v509_v48 = vrot.slane %v96_v25, %v1771_v58 }
  0xb8   :  { %v930_v51 = vrot.slane %v902_v42, %v1786_v1  ;;  %v931_v52 = vcombine.low %v909_v43, %v916_v44  ;;  %v513_v54 = vrot.slane %v96_v25, %v1774_v59  ;;  %v517_v63 = vrot.slane %v96_v25, %v1777_v60 }
  0xb9   :  { %v1143_v2 = vcombine.low %v1135_v39, %v1142_v46  ;;  %v521_v3 = vrot.slane %v96_v25, %v1780_v61  ;;  %v525_v4 = vrot.slane %v96_v25, %v1783_v62  ;;  %v1193_v6 = vcombine.low %v497_v41, %v501_v45 }
  0xba   :  { %v932_v7 = vcombine.low %v923_v32, %v930_v51  ;;  %v939_v0 = vrot.slane %v931_v52, %v1786_v1  ;;  %v1194_v8 = vcombine.low %v505_v47, %v509_v48  ;;  %v1195_v9 = vcombine.low %v513_v54, %v517_v63 }
  0xbb   :  { %1466 = vperm.xlu0 %1641, %v1143_v2   ;;  %v1196_v10 = vcombine.low %v521_v3, %v525_v4  ;;  %v1203_v11 = vrot.slane %v1193_v6, %v1786_v1  ;;  %v337_v12 = vrot.slane %v81_v49, %v1762_v55  ;;  %v341_v13 = vrot.slane %v81_v49, %v1765_v56 }
  0xbc   :  { %v946_v14 = vrot.slane %v932_v7, %v1786_v1  ;;  %v1210_v16 = vrot.slane %v1194_v8, %v1786_v1  ;;  %v1217_v17 = vrot.slane %v1195_v9, %v1786_v1  ;;  %v345_v18 = vrot.slane %v81_v49, %v1768_v57 }
  0xbd   :  { %v1224_v20 = vrot.slane %v1196_v10, %v1786_v1  ;;  %v349_v21 = vrot.slane %v81_v49, %v1771_v58  ;;  %v353_v22 = vrot.slane %v81_v49, %v1774_v59  ;;  %v357_v23 = vrot.slane %v81_v49, %v1777_v60 }
  0xbe   :  { %v947_v24 = vcombine.low %v939_v0, %v946_v14  ;;  %v1225_v25 = vcombine.low %v1203_v11, %v1210_v16  ;;  %v361_v26 = vrot.slane %v81_v49, %v1780_v61  ;;  %v365_v27 = vrot.slane %v81_v49, %v1783_v62  ;;  %v108_v0 = vpop.xlane.xlu1 %107 }
  0xbf   :  { %v1226_v28 = vcombine.low %v1217_v17, %v1224_v20  ;;  %v948_v29 = vcombine.low %v337_v12, %v341_v13  ;;  %v949_v30 = vcombine.low %v345_v18, %v349_v21  ;;  %v950_v31 = vcombine.low %v353_v22, %v357_v23  ;;  %v87_v21 = vpop.xlane.xlu0 %86 }
  0xc0   :  { %1454 = vperm.xlu1 %1642, %v947_v24   ;;  %v1233_v33 = vrot.slane %v1225_v25, %v1786_v1  ;;  %v951_v34 = vcombine.low %v361_v26, %v365_v27  ;;  %v561_v15 = vrot.slane %v102_v19, %v1762_v55  ;;  %v565_v35 = vrot.slane %v102_v19, %v1765_v56 }
  0xc1   :  { %v1240_v36 = vrot.slane %v1226_v28, %v1786_v1  ;;  %v958_v37 = vrot.slane %v948_v29, %v1786_v1  ;;  %v965_v38 = vrot.slane %v949_v30, %v1786_v1  ;;  %v972_v39 = vrot.slane %v950_v31, %v1786_v1 }
  0xc2   :  { %v979_v40 = vrot.slane %v951_v34, %v1786_v1  ;;  %v569_v41 = vrot.slane %v102_v19, %v1768_v57  ;;  %v573_v42 = vrot.slane %v102_v19, %v1771_v58  ;;  %v577_v43 = vrot.slane %v102_v19, %v1774_v59 }
  0xc3   :  { %v1241_v44 = vcombine.low %v1233_v33, %v1240_v36  ;;  %v980_v45 = vcombine.low %v958_v37, %v965_v38  ;;  %v581_v46 = vrot.slane %v102_v19, %v1777_v60  ;;  %v585_v32 = vrot.slane %v102_v19, %v1780_v61 }
  0xc4   :  { %v981_v47 = vcombine.low %v972_v39, %v979_v40  ;;  %v589_v48 = vrot.slane %v102_v19, %v1783_v62  ;;  %v1291_v49 = vcombine.low %v561_v15, %v565_v35  ;;  %v1292_v51 = vcombine.low %v569_v41, %v573_v42 }
  0xc5   :  { %1472 = vperm.xlu0 %1641, %v1241_v44   ;;  %v988_v52 = vrot.slane %v980_v45, %v1786_v1  ;;  %v1293_v54 = vcombine.low %v577_v43, %v581_v46  ;;  %v369_v63 = vrot.slane %v1829_v5, %v1762_v55  ;;  %v373_v2 = vrot.slane %v1829_v5, %v1765_v56  ;;  %v93_v45 = vpop.xlane.xlu0 %92 }
  0xc6   :  { %v995_v3 = vrot.slane %v981_v47, %v1786_v1  ;;  %v1294_v4 = vcombine.low %v585_v32, %v589_v48  ;;  %v1301_v6 = vrot.slane %v1291_v49, %v1786_v1  ;;  %v1308_v7 = vrot.slane %v1292_v51, %v1786_v1 }
  0xc7   :  { %v1315_v8 = vrot.slane %v1293_v54, %v1786_v1  ;;  %v377_v9 = vrot.slane %v1829_v5, %v1768_v57  ;;  %v381_v10 = vrot.slane %v1829_v5, %v1771_v58  ;;  %v385_v11 = vrot.slane %v1829_v5, %v1774_v59 }
  0xc8   :  { %v996_v12 = vcombine.low %v988_v52, %v995_v3  ;;  %v1322_v13 = vrot.slane %v1294_v4, %v1786_v1  ;;  %v1323_v14 = vcombine.low %v1301_v6, %v1308_v7  ;;  %v389_v16 = vrot.slane %v1829_v5, %v1777_v60 }
  0xc9   :  { %v393_v17 = vrot.slane %v1829_v5, %v1780_v61  ;;  %v397_v18 = vrot.slane %v1829_v5, %v1783_v62  ;;  %v997_v19 = vcombine.low %v369_v63, %v373_v2  ;;  %v998_v20 = vcombine.low %v377_v9, %v381_v10 }
  0xca   :  { %1457 = vperm.xlu1 %1642, %v996_v12   ;;  %v1324_v22 = vcombine.low %v1315_v8, %v1322_v13  ;;  %v1331_v23 = vrot.slane %v1323_v14, %v1786_v1  ;;  %v999_v24 = vcombine.low %v385_v11, %v389_v16  ;;  %v625_v25 = vrot.slane %v108_v0, %v1762_v55 }
  0xcb   :  { %v1000_v26 = vcombine.low %v393_v17, %v397_v18  ;;  %v1007_v27 = vrot.slane %v997_v19, %v1786_v1  ;;  %v1014_v28 = vrot.slane %v998_v20, %v1786_v1  ;;  %v629_v29 = vrot.slane %v108_v0, %v1765_v56  ;;  %v99_v18 = vpop.xlane.xlu0 %98 }
  0xcc   :  { %v1338_v30 = vrot.slane %v1324_v22, %v1786_v1  ;;  %v1021_v5 = vrot.slane %v999_v24, %v1786_v1  ;;  %v633_v31 = vrot.slane %v108_v0, %v1768_v57  ;;  %v637_v33 = vrot.slane %v108_v0, %v1771_v58 }
  0xcd   :  { %v1028_v34 = vrot.slane %v1000_v26, %v1786_v1  ;;  %v1029_v15 = vcombine.low %v1007_v27, %v1014_v28  ;;  %v641_v35 = vrot.slane %v108_v0, %v1774_v59  ;;  %v645_v36 = vrot.slane %v108_v0, %v1777_v60 }
  0xce   :  { %v1339_v37 = vcombine.low %v1331_v23, %v1338_v30  ;;  %v649_v38 = vrot.slane %v108_v0, %v1780_v61  ;;  %v653_v39 = vrot.slane %v108_v0, %v1783_v62  ;;  %v1389_v40 = vcombine.low %v625_v25, %v629_v29 }
  0xcf   :  { %v1030_v41 = vcombine.low %v1021_v5, %v1028_v34  ;;  %v1037_v42 = vrot.slane %v1029_v15, %v1786_v1  ;;  %v1390_v43 = vcombine.low %v633_v31, %v637_v33  ;;  %v1391_v44 = vcombine.low %v641_v35, %v645_v36 }
  0xd0   :  { %1478 = vperm.xlu0 %1641, %v1339_v37   ;;  %v1392_v46 = vcombine.low %v649_v38, %v653_v39  ;;  %v1399_v32 = vrot.slane %v1389_v40, %v1786_v1  ;;  %v401_v47 = vrot.slane %v87_v21, %v1762_v55  ;;  %v405_v48 = vrot.slane %v87_v21, %v1765_v56 }
  0xd1   :  { %v1044_v49 = vrot.slane %v1030_v41, %v1786_v1  ;;  %v1406_v51 = vrot.slane %v1390_v43, %v1786_v1  ;;  %v1413_v52 = vrot.slane %v1391_v44, %v1786_v1  ;;  %v409_v54 = vrot.slane %v87_v21, %v1768_v57 }
  0xd2   :  { %v1420_v63 = vrot.slane %v1392_v46, %v1786_v1  ;;  %v413_v2 = vrot.slane %v87_v21, %v1771_v58  ;;  %v417_v3 = vrot.slane %v87_v21, %v1774_v59  ;;  %v421_v4 = vrot.slane %v87_v21, %v1777_v60 }
  0xd3   :  { %v1045_v6 = vcombine.low %v1037_v42, %v1044_v49  ;;  %v1421_v7 = vcombine.low %v1399_v32, %v1406_v51  ;;  %v425_v0 = vrot.slane %v87_v21, %v1780_v61  ;;  %v429_v8 = vrot.slane %v87_v21, %v1783_v62  ;;  %v105_v42 = vpop.xlane.xlu0 %104 }
  0xd4   :  { %v1422_v9 = vcombine.low %v1413_v52, %v1420_v63  ;;  %v1046_v10 = vcombine.low %v401_v47, %v405_v48  ;;  %v1047_v11 = vcombine.low %v409_v54, %v413_v2  ;;  %v1048_v12 = vcombine.low %v417_v3, %v421_v4 }
  0xd5   :  { %1460 = vperm.xlu1 %1642, %v1045_v6   ;;  %v1429_v13 = vrot.slane %v1421_v7, %v1786_v1  ;;  %v1049_v14 = vcombine.low %v425_v0, %v429_v8  ;;  %v465_v16 = vrot.slane %v93_v45, %v1762_v55  ;;  %v469_v17 = vrot.slane %v93_v45, %v1765_v56 }
  0xd6   :  { %v1436_v19 = vrot.slane %v1422_v9, %v1786_v1  ;;  %v1056_v20 = vrot.slane %v1046_v10, %v1786_v1  ;;  %v1063_v22 = vrot.slane %v1047_v11, %v1786_v1  ;;  %v1070_v21 = vrot.slane %v1048_v12, %v1786_v1 }
  0xd7   :  { %v1077_v23 = vrot.slane %v1049_v14, %v1786_v1  ;;  %v473_v24 = vrot.slane %v93_v45, %v1768_v57  ;;  %v477_v25 = vrot.slane %v93_v45, %v1771_v58  ;;  %v481_v26 = vrot.slane %v93_v45, %v1774_v59 }
  0xd8   :  { %v1437_v27 = vcombine.low %v1429_v13, %v1436_v19  ;;  %v1078_v28 = vcombine.low %v1056_v20, %v1063_v22  ;;  %v485_v29 = vrot.slane %v93_v45, %v1777_v60  ;;  %v489_v30 = vrot.slane %v93_v45, %v1780_v61 }
  0xd9   :  { %v1079_v5 = vcombine.low %v1070_v21, %v1077_v23  ;;  %v493_v31 = vrot.slane %v93_v45, %v1783_v62  ;;  %v1144_v33 = vcombine.low %v465_v16, %v469_v17  ;;  %v1145_v34 = vcombine.low %v473_v24, %v477_v25 }
  0xda   :  { %1484 = vperm.xlu0 %1641, %v1437_v27   ;;  %v1086_v15 = vrot.slane %v1078_v28, %v1786_v1  ;;  %v1146_v35 = vcombine.low %v481_v26, %v485_v29  ;;  %v529_v36 = vrot.slane %v99_v18, %v1762_v55  ;;  %v533_v37 = vrot.slane %v99_v18, %v1765_v56 }
  0xdb   :  { %v1093_v38 = vrot.slane %v1079_v5, %v1786_v1  ;;  %v1147_v39 = vcombine.low %v489_v30, %v493_v31  ;;  %v1154_v40 = vrot.slane %v1144_v33, %v1786_v1  ;;  %v1161_v41 = vrot.slane %v1145_v34, %v1786_v1 }
  0xdc   :  { %v1168_v43 = vrot.slane %v1146_v35, %v1786_v1  ;;  %v537_v44 = vrot.slane %v99_v18, %v1768_v57  ;;  %v541_v45 = vrot.slane %v99_v18, %v1771_v58  ;;  %v545_v46 = vrot.slane %v99_v18, %v1774_v59 }
  0xdd   :  { %v1094_v32 = vcombine.low %v1086_v15, %v1093_v38  ;;  %v1175_v47 = vrot.slane %v1147_v39, %v1786_v1  ;;  %v1176_v48 = vcombine.low %v1154_v40, %v1161_v41  ;;  %v549_v49 = vrot.slane %v99_v18, %v1777_v60 }
  0xde   :  { %v553_v51 = vrot.slane %v99_v18, %v1780_v61  ;;  %v557_v52 = vrot.slane %v99_v18, %v1783_v62  ;;  %v1242_v54 = vcombine.low %v529_v36, %v533_v37  ;;  %v1243_v63 = vcombine.low %v537_v44, %v541_v45 }
  0xdf   :  { %1463 = vperm.xlu1 %1642, %v1094_v32   ;;  %v1177_v2 = vcombine.low %v1168_v43, %v1175_v47  ;;  %v1184_v3 = vrot.slane %v1176_v48, %v1786_v1  ;;  %v1244_v4 = vcombine.low %v545_v46, %v549_v49  ;;  %v593_v6 = vrot.slane %v105_v42, %v1762_v55 }
  0xe0   :  { %v1245_v7 = vcombine.low %v553_v51, %v557_v52  ;;  %v1252_v0 = vrot.slane %v1242_v54, %v1786_v1  ;;  %v1259_v8 = vrot.slane %v1243_v63, %v1786_v1  ;;  %v597_v9 = vrot.slane %v105_v42, %v1765_v56 }
  0xe1   :  { %v1191_v10 = vrot.slane %v1177_v2, %v1786_v1  ;;  %v1266_v11 = vrot.slane %v1244_v4, %v1786_v1  ;;  %v601_v12 = vrot.slane %v105_v42, %v1768_v57  ;;  %v605_v13 = vrot.slane %v105_v42, %v1771_v58 }
  0xe2   :  { %v1273_v14 = vrot.slane %v1245_v7, %v1786_v1  ;;  %v1274_v16 = vcombine.low %v1252_v0, %v1259_v8  ;;  %v609_v55 = vrot.slane %v105_v42, %v1774_v59  ;;  %v613_v17 = vrot.slane %v105_v42, %v1777_v60 }
  0xe3   :  { %v1192_v18 = vcombine.low %v1184_v3, %v1191_v10  ;;  %v617_v19 = vrot.slane %v105_v42, %v1780_v61  ;;  %v621_v56 = vrot.slane %v105_v42, %v1783_v62  ;;  %v1340_v20 = vcombine.low %v593_v6, %v597_v9 }
  0xe4   :  { %v1275_v22 = vcombine.low %v1266_v11, %v1273_v14  ;;  %v1282_v21 = vrot.slane %v1274_v16, %v1786_v1  ;;  %v1341_v23 = vcombine.low %v601_v12, %v605_v13  ;;  %v1342_v57 = vcombine.low %v609_v55, %v613_v17 }
  0xe5   :  { %1469 = vperm.xlu1 %1642, %v1192_v18   ;;  %v1343_v58 = vcombine.low %v617_v19, %v621_v56  ;;  %v1350_v24 = vrot.slane %v1340_v20, %v1786_v1  ;;  %v1669_v5 = vmov 0.0   ;;  %v2043_v36 = vand.u32 127, %v142_v50 }
  0xe6   :  { %v1289_v25 = vrot.slane %v1275_v22, %v1786_v1  ;;  %v1357_v59 = vrot.slane %v1341_v23, %v1786_v1  ;;  %v1364_v60 = vrot.slane %v1342_v57, %v1786_v1  ;;  %20 = vst [vmem:[#allocation3] sm:$0x1] %v1669_v5 }
  0xe7   :  { %v1371_v61 = vrot.slane %v1343_v58, %v1786_v1  ;;  %v1492_v37 = vadd.s32 4294967288, %v2043_v36  ;;  %v1499_v39 = vadd.s32 4294967280, %v2043_v36  ;;  %v1506_v40 = vadd.s32 4294967272, %v2043_v36 }
  0xe8   :  { %v1290_v26 = vcombine.low %v1282_v21, %v1289_v25  ;;  %v1372_v62 = vcombine.low %v1350_v24, %v1357_v59  ;;  %v1513_v41 = vadd.s32 4294967264, %v2043_v36  ;;  %v1520_v43 = vadd.s32 4294967256, %v2043_v36 }
  0xe9   :  { %v1373_v27 = vcombine.low %v1364_v60, %v1371_v61  ;;  %v1495_v42 = vsub.s32 %v1492_v37, %v1759_v53  ;;  %v1502_v45 = vsub.s32 %v1499_v39, %v1759_v53  ;;  %v1527_v46 = vadd.s32 4294967248, %v2043_v36 }
  0xea   :  { %1475 = vperm.xlu1 %1642, %v1290_v26   ;;  %v1380_v28 = vrot.slane %v1372_v62, %v1786_v1  ;;  %v1490_v50 = vsub.s32 %v2043_v36, %v1759_v53  ;;  %v1509_v32 = vsub.s32 %v1506_v40, %v1759_v53  ;;  %v1534_v47 = vadd.s32 4294967240, %v2043_v36 }
  0xeb   :  { %v1387_v29 = vrot.slane %v1373_v27, %v1786_v1  ;;  %v1516_v49 = vsub.s32 %v1513_v41, %v1759_v53  ;;  %v1541_v51 = vadd.s32 4294967232, %v2043_v36  ;;  %v1523_v54 = vsub.s32 %v1520_v43, %v1759_v53 }
  0xec   :  { %v1530_v3 = vsub.s32 %v1527_v46, %v1759_v53  ;;  %v1537_v7 = vsub.s32 %v1534_v47, %v1759_v53  ;;  %v1555_v9 = vadd.s32 4294967216, %v2043_v36  ;;  %v1548_v11 = vadd.s32 4294967224, %v2043_v36 }
  0xed   :  { %v1388_v30 = vcombine.low %v1380_v28, %v1387_v29  ;;  %v1544_v8 = vsub.s32 %v1541_v51, %v1759_v53  ;;  %v1562_v17 = vadd.s32 4294967208, %v2043_v36  ;;  %v1569_v57 = vadd.s32 4294967200, %v2043_v36  ;;  %v125_v47 = vld [vmem:[#allocation3] sm:$0x1] }
  0xee   :  { %v1558_v22 = vsub.s32 %v1555_v9, %v1759_v53  ;;  %v1551_v21 = vsub.s32 %v1548_v11, %v1759_v53  ;;  %v1576_v59 = vadd.s32 4294967192, %v2043_v36  ;;  %v1583_v29 = vadd.s32 4294967184, %v2043_v36 }
  0xef   :  { %1481 = vperm.xlu1 %1642, %v1388_v30   ;;  %v1565_v62 = vsub.s32 %v1562_v17, %v1759_v53  ;;  %v1572_v27 = vsub.s32 %v1569_v57, %v1759_v53  ;;  %v1590_v30 = vadd.s32 4294967176, %v2043_v36 }
  0xf0   :  { %v1586_v37 = vsub.s32 %v1583_v29, %v1759_v53 }
 0x120   :  { %v1440_v44 = vpop.permute.xlu0 %1439 }
 0x121   :  { %v1491_v4 = vrot.slane %v1440_v44, %v1490_v50 }
 0x126   :  { %v1443_v31 = vpop.permute.xlu1 %1442 }
 0x127   :  { %v1496_v52 = vrot.slane %v1443_v31, %v1495_v42 }
 0x129   :  { %v1498_v10 = vsel %vm1497_vm1, %v1496_v52, %v1491_v4 }
 0x12a   :  { %v1446_v33 = vpop.permute.xlu1 %1445 }
 0x12b   :  { %v1503_v63 = vrot.slane %v1446_v33, %v1502_v45 }
 0x12d   :  { %v1505_v14 = vsel %vm1504_vm2, %v1503_v63, %v1498_v10 }
 0x12f   :  { %v1449_v34 = vpop.permute.xlu1 %1448 }
 0x130   :  { %v1510_v6 = vrot.slane %v1449_v34, %v1509_v32 }
 0x132   :  { %v1512_v55 = vsel %vm1511_vm3, %v1510_v6, %v1505_v14 }
 0x134   :  { %v1452_v15 = vpop.permute.xlu1 %1451 }
 0x135   :  { %v1517_v0 = vrot.slane %v1452_v15, %v1516_v49  ;;  %v1579_v15 = vsub.s32 %v1576_v59, %v1759_v53 }
 0x137   :  { %v1519_v19 = vsel %vm1518_vm4, %v1517_v0, %v1512_v55 }
 0x13a   :  { %v1467_v2 = vpop.permute.xlu0 %1466 }
 0x13b   :  { %v1552_v26 = vrot.slane %v1467_v2, %v1551_v21 }
 0x13f   :  { %v1455_v35 = vpop.permute.xlu1 %1454 }
 0x140   :  { %v1524_v12 = vrot.slane %v1455_v35, %v1523_v54 }
 0x142   :  { %v1526_v23 = vsel %vm1525_vm5, %v1524_v12, %v1519_v19 }
 0x144   :  { %v1473_v56 = vpop.permute.xlu0 %1472 }
 0x145   :  { %v1566_v34 = vrot.slane %v1473_v56, %v1565_v62 }
 0x149   :  { %v1458_v38 = vpop.permute.xlu1 %1457 }
 0x14a   :  { %v1531_v16 = vrot.slane %v1458_v38, %v1530_v3  ;;  %v1593_v38 = vsub.s32 %v1590_v30, %v1759_v53  ;;  %v1619_v53 = vstv %s2096_s2 }
 0x14c   :  { %v1533_v58 = vsel %vm1532_vm6, %v1531_v16, %v1526_v23 }
 0x14f   :  { %v1479_v28 = vpop.permute.xlu0 %1478 }
 0x150   :  { %v1580_v42 = vrot.slane %v1479_v28, %v1579_v15 }
 0x154   :  { %v1461_v48 = vpop.permute.xlu1 %1460 }
 0x155   :  { %v1538_v18 = vrot.slane %v1461_v48, %v1537_v7 }
 0x157   :  { %v1540_v24 = vsel %vm1539_vm7, %v1538_v18, %v1533_v58 }
 0x159   :  { %v1485_v40 = vpop.permute.xlu0 %1484 }
 0x15a   :  { %v1594_v44 = vrot.slane %v1485_v40, %v1593_v38 }
 0x15e   :  { %v1464_v13 = vpop.permute.xlu1 %1463 }
 0x15f   :  { %v1545_v20 = vrot.slane %v1464_v13, %v1544_v8 }
 0x161   :  { %v1547_v60 = vsel %vm1546_vm8, %v1545_v20, %v1540_v24 }
 0x162   :  { %v1554_v5 = vsel %vm1553_vm9, %v1552_v26, %v1547_v60 }
 0x164   :  { %v1470_v25 = vpop.permute.xlu1 %1469 }
 0x165   :  { %v1559_v61 = vrot.slane %v1470_v25, %v1558_v22 }
 0x167   :  { %v1561_v31 = vsel %vm1560_vm10, %v1559_v61, %v1554_v5 }
 0x168   :  { %v1568_v39 = vsel %vm1567_vm11, %v1566_v34, %v1561_v31 }
 0x169   :  { %v1476_v33 = vpop.permute.xlu1 %1475 }
 0x16a   :  { %v1573_v35 = vrot.slane %v1476_v33, %v1572_v27 }
 0x16c   :  { %v1575_v41 = vsel %vm1574_vm12, %v1573_v35, %v1568_v39 }
 0x16d   :  { %v1582_v45 = vsel %vm1581_vm13, %v1580_v42, %v1575_v41 }
 0x16e   :  { %v1482_v36 = vpop.permute.xlu1 %1481 }
 0x16f   :  { %v1587_v43 = vrot.slane %v1482_v36, %v1586_v37 }
 0x171   :  { %v1589_v46 = vsel %vm1588_vm14, %v1587_v43, %v1582_v45 }
 0x172   :  { %v1596_v50 = vsel %vm1595_vm15, %v1594_v44, %v1589_v46 }
 0x173   :  { %v1603_v32 = vrot.slane %v1596_v50, %v1786_v1 }
 0x175   :  { %v1610_v48 = vrot.slane %v1603_v32, %v1786_v1 }
 0x177   :  { %v1612_v49 = vadd.f32 %v1610_v48, %v125_v47 }
 0x179   :  { %1613 = vst [vmem:[#allocation3] sm:$0x1] %v1612_v49 }
 0x180   :  { %v1617_v51 = vld [vmem:[#allocation3] sm:$0x1] }
 0x181   :  { %v1620_v52 = vadd.f32 %v1619_v53, %v1617_v51 }
 0x183   :  { %1621 = vst [vmem:[#allocation3] sm:$0x1] %v1620_v52 }
 0x184   :  { %1654 = shalt.err (!%p1651_p4)
}
 0x185   :  { %s1655_s24 = scalar_lea.hbm %s2097_s3, 16 }
 0x186   :  { %p1656_p5 = scmp.ne.s32.totalorder %s2097_s3, %s1655_s24  ;;  %p1659_p6 = scmp.lt.u32.totalorder %s1655_s24, %s2097_s3 }
 0x188   :  { %p1661_p7 = pnand %p1659_p6, %p1656_p5 }
 0x18a   :  { %1664 = shalt.err (!%p1661_p7)
}
 0x18b   :  { %1631 = dma.vmem_to_hbm [thread:$0]  %s1629_s20, 16, %s2097_s3, [#allocation4]  }
 0x18c   :  { %1665 = dma.done.wait [#allocation4], 16  }
 0x18d   :  { %1666 = vsyncadd [#allocation4], 4294967280 }
 0x18e   :  { %1635 = vsyncpa [#allocation4], 1 }

</bundles_post_ra>
